<compile_context>
chip_gen: v7x
topology: tpu7x:2x2x1
jax: 0.10.0
libtpu: 0.0.40
codegen_flags: <defaults>
</compile_context>

<pallas_src>
import functools
import math

import jax
import jax.numpy as jnp
from jax.experimental import pallas as pl
from jax.experimental.pallas import tpu as pltpu

MOMENTUM = 0.1
EPS = 1e-7
_SQRT_HALF_PI = math.sqrt(math.pi / 2.0)


# ----------------------------------------------------------------------------
# Kernels
# ----------------------------------------------------------------------------
def _meanbn_onepass_kernel(x_ref, w_ref, b_ref, rm_ref, rv_ref,       # inputs
                           out_ref, rm_out_ref, rv_out_ref,           # outputs
                           *, inv_n):
    """Single-pass path: whole (B, tile_c, S) slab is resident in VMEM."""
    x = x_ref[...].astype(jnp.float32)                      # (B, tc, S)
    s = x.shape[-1]
    ones_s = jnp.ones((s, 1), dtype=jnp.float32)

    # mean: batch reduce on the VALU, lane reduce on the MXU (keeps XLU free).
    sum_b = jnp.sum(x, axis=0)                              # (tc, S)
    mean = jnp.dot(sum_b, ones_s,
                   preferred_element_type=jnp.float32) * inv_n          # (tc, 1)

    # mean absolute deviation, same reduction structure.
    absdev_b = jnp.sum(jnp.abs(x - mean[None]), axis=0)     # (tc, S)
    mad = jnp.dot(absdev_b, ones_s,
                  preferred_element_type=jnp.float32) * inv_n           # (tc, 1)

    scale = pl.reciprocal(mad * _SQRT_HALF_PI + EPS)        # (tc, 1)
    g = scale * w_ref[...]                                  # fold scale*weight
    beta = b_ref[...] - mean * g                            # fold bias - mean*g

    # Lane-dense single write of the output: out = x*g + beta (2 ops/elem).
    out_ref[...] = (x * g[None] + beta[None]).astype(out_ref.dtype)

    # Running stats (mirrors the PyTorch module: running_var tracks `scale`).
    rm_out_ref[...] = rm_ref[...] * MOMENTUM + mean * (1.0 - MOMENTUM)
    rv_out_ref[...] = rv_ref[...] * MOMENTUM + scale * (1.0 - MOMENTUM)


def _meanbn_stream_kernel(x_ref, w_ref, b_ref, rm_ref, rv_ref,        # inputs
                          out_ref, rm_out_ref, rv_out_ref,            # outputs
                          acc_sc, mean_sc, g_sc, beta_sc,             # scratch
                          *, inv_n):
    """3-phase streaming fallback for slabs that do not fit VMEM."""
    ph = pl.program_id(1)
    bi = pl.program_id(2)
    si = pl.program_id(3)
    is_first = jnp.logical_and(bi == 0, si == 0)
    is_last = jnp.logical_and(bi == pl.num_programs(2) - 1,
                              si == pl.num_programs(3) - 1)

    # ---- phase 0: per-channel sum(x) -> mean -------------------------------
    @pl.when(ph == 0)
    def _phase0():
        @pl.when(is_first)
        def _():
            acc_sc[...] = jnp.zeros_like(acc_sc)

        x = x_ref[...].astype(jnp.float32)                  # (tile_c, tile_s)
        ones_s = jnp.ones((x.shape[1], 1), dtype=jnp.float32)
        acc_sc[...] += jnp.dot(x, ones_s, preferred_element_type=jnp.float32)

        @pl.when(is_last)
        def _():
            mean_sc[...] = acc_sc[...] * inv_n              # multiply, not divide
            acc_sc[...] = jnp.zeros_like(acc_sc)            # re-use for phase 1

    # ---- phase 1: per-channel sum|x - mean| -> scale, finalize stats --------
    @pl.when(ph == 1)
    def _phase1():
        x = x_ref[...].astype(jnp.float32)
        ones_s = jnp.ones((x.shape[1], 1), dtype=jnp.float32)
        a = jnp.abs(x - mean_sc[...])
        acc_sc[...] += jnp.dot(a, ones_s, preferred_element_type=jnp.float32)

        @pl.when(is_last)
        def _():
            mad = acc_sc[...] * inv_n
            scale = pl.reciprocal(mad * _SQRT_HALF_PI + EPS)
            g = scale * w_ref[...]
            g_sc[...] = g
            beta_sc[...] = b_ref[...] - mean_sc[...] * g
            # Running-stat updates: executed exactly once per channel tile.
            rm_out_ref[...] = rm_ref[...] * MOMENTUM + mean_sc[...] * (1.0 - MOMENTUM)
            rv_out_ref[...] = rv_ref[...] * MOMENTUM + scale * (1.0 - MOMENTUM)

    # ---- phase 2: out = x*g + beta, lane-dense single HBM write -------------
    @pl.when(ph == 2)
    def _phase2():
        x = x_ref[...].astype(jnp.float32)
        out_ref[...] = (x * g_sc[...] + beta_sc[...]).astype(out_ref.dtype)


# ----------------------------------------------------------------------------
# Tiling / budgeting helpers
# ----------------------------------------------------------------------------
def _vmem_capacity_bytes():
    try:
        return int(pltpu.get_tpu_info().vmem_capacity_bytes)
    except Exception:
        return 64 * 1024 * 1024        # v7x-safe conservative default


def _sublane_min(dtype):
    # f32 -> (8,128) tiles; 16-bit dtypes pack two rows per sublane -> (16,128).
    return 16 if jnp.dtype(dtype).itemsize == 2 else 8


def _channel_tile_candidates(C, sublane_min):
    """Divisors of C legal as a second-to-last block dim, descending."""
    return [t for t in range(C, 0, -1)
            if C % t == 0 and (t == C or t % sublane_min == 0)]


def _fast_path_tile_c(B, C, S, x_dtype, vmem_limit):
    """Largest legal channel tile whose whole-slab path fits VMEM, or None."""
    itemsize = jnp.dtype(x_dtype).itemsize
    # 2x double-buffered input + 2x double-buffered output (same dtype) plus
    # ~3 slab-sized f32 temporaries materialized inside the kernel body.
    per_elem = 2 * itemsize + 2 * itemsize + 3 * 4
    cands = _channel_tile_candidates(C, _sublane_min(x_dtype))
    fitting = [t for t in cands
               if B * t * S * per_elem + (1 << 20) <= vmem_limit]
    if not fitting:
        return None
    # Prefer >= 2 channel tiles so the (only) parallel grid axis can feed both
    # v7x TensorCores; harmless on single-TC v5e/v6e.
    split = [t for t in fitting if C // t >= 2]
    return split[0] if split else fitting[0]


def _stream_tiles(C, S, x_dtype, block_bytes_cap):
    """(tile_c, tile_s) for the streaming path, sized to the per-chip cap."""
    c_cands = _channel_tile_candidates(C, _sublane_min(x_dtype))
    if len(c_cands) > 1:
        c_cands = [t for t in c_cands if C // t >= 2] or c_cands
    if S % 128 == 0:
        s_cands = [t for t in range(S, 0, -128) if S % t == 0]
    else:
        # TODO(synk): S not a multiple of 128 forces the full spatial extent
        # into one block; pad-and-mask would be needed to tile it further.
        s_cands = [S]
    cap_elems = max(1, block_bytes_cap // 4)     # budget blocks in f32 terms
    best = (c_cands[-1], s_cands[-1])            # smallest legal combination
    best_e = best[0] * best[1]
    for tc in c_cands:
        for ts in s_cands:
            e = tc * ts
            if e <= cap_elems and e > best_e:
                best, best_e = (tc, ts), e
    return best


# ----------------------------------------------------------------------------
# Wrapper
# ----------------------------------------------------------------------------
def mean_bn_forward(x_nchw, weight, bias, running_mean, running_var,
                    *, force_multipass=False):
    """Training-mode MeanBN forward.

    x_nchw:       (B, C, H, W) float32 or bfloat16
    weight, bias: (C,)  (PyTorch's self.scale / self.mean parameters)
    running_*:    (C,)
    returns (out_nchw, new_running_mean, new_running_var)
    """
    B, C, H, W = x_nchw.shape
    S = H * W

    # Free reshapes only -- channels stay on sublanes, spatial goes to lanes.
    x = x_nchw.reshape(B, C, S)
    w = weight.astype(jnp.float32).reshape(C, 1)
    b = bias.astype(jnp.float32).reshape(C, 1)
    rm = running_mean.astype(jnp.float32).reshape(C, 1)
    rv = running_var.astype(jnp.float32).reshape(C, 1)
    inv_n = 1.0 / float(B * S)

    cap = _vmem_capacity_bytes()
    vmem_limit = int(cap * 0.80)          # ~51 MiB on v7x, ~102 MiB on v5e/v6e

    vec_shape = jax.ShapeDtypeStruct((C, 1), jnp.float32)
    out_shape = jax.ShapeDtypeStruct((B, C, S), x_nchw.dtype)

    fast_tc = None if force_multipass else _fast_path_tile_c(B, C, S, x.dtype,
                                                             vmem_limit)

    if fast_tc is not None:
        # ---------------- single-pass fast path: 1 read + 1 write ----------
        n_c = C // fast_tc
        slab_spec = pl.BlockSpec((B, fast_tc, S), lambda ci: (0, ci, 0))
        vec_spec = pl.BlockSpec((fast_tc, 1), lambda ci: (ci, 0))
        kernel = functools.partial(_meanbn_onepass_kernel, inv_n=inv_n)
        out, rm_new, rv_new = pl.pallas_call(
            kernel,
            grid=(n_c,),
            in_specs=[slab_spec, vec_spec, vec_spec, vec_spec, vec_spec],
            out_specs=(slab_spec, vec_spec, vec_spec),
            out_shape=(out_shape, vec_shape, vec_shape),
            compiler_params=pltpu.CompilerParams(
                dimension_semantics=("parallel",),
                vmem_limit_bytes=vmem_limit,
            ),
        )(x, w, b, rm, rv)
    else:
        # ---------------- 3-phase streaming fallback: 3 reads + 1 write ----
        tile_c, tile_s = _stream_tiles(C, S, x.dtype, cap // 8)
        n_c = C // tile_c
        n_s = S // tile_s
        grid = (n_c, 3, B, n_s)   # (channel tiles, phase, batch, spatial tiles)

        x_spec = pl.BlockSpec((None, tile_c, tile_s),
                              lambda ci, ph, bi, si: (bi, ci, si))
        vec_spec = pl.BlockSpec((tile_c, 1), lambda ci, ph, bi, si: (ci, 0))
        # Output block index is pinned to (0, ci, 0) during phases 0/1 (never
        # written, never flushed because the index does not change there) and
        # follows (bi, ci, si) during phase 2 -> output HBM written exactly
        # once.  Validated against the reference in __main__ with B>1.
        out_spec = pl.BlockSpec(
            (None, tile_c, tile_s),
            lambda ci, ph, bi, si: (bi * (ph // 2), ci, si * (ph // 2)))

        kernel = functools.partial(_meanbn_stream_kernel, inv_n=inv_n)
        out, rm_new, rv_new = pl.pallas_call(
            kernel,
            grid=grid,
            in_specs=[x_spec, vec_spec, vec_spec, vec_spec, vec_spec],
            out_specs=(out_spec, vec_spec, vec_spec),
            out_shape=(out_shape, vec_shape, vec_shape),
            scratch_shapes=[
                pltpu.VMEM((tile_c, 1), jnp.float32),   # partial-sum accumulator
                pltpu.VMEM((tile_c, 1), jnp.float32),   # per-channel mean
                pltpu.VMEM((tile_c, 1), jnp.float32),   # g = scale * weight
                pltpu.VMEM((tile_c, 1), jnp.float32),   # beta = bias - mean*g
            ],
            compiler_params=pltpu.CompilerParams(
                dimension_semantics=("parallel", "arbitrary",
                                     "arbitrary", "arbitrary"),
                vmem_limit_bytes=vmem_limit,
            ),
        )(x, w, b, rm, rv)

    return out.reshape(B, C, H, W), rm_new.reshape(C), rv_new.reshape(C)


# ----------------------------------------------------------------------------
# Reference + test
# ----------------------------------------------------------------------------
def _reference(x, weight, bias, running_mean, running_var):
    """Pure-JAX reference mirroring the PyTorch module (training mode)."""
    B, C, H, W = x.shape
    mean = x.reshape(B, C, -1).mean(-1).mean(0)                       # (C,)
    t = jnp.transpose(x, (1, 0, 2, 3)).reshape(C, -1)                 # (C, B*H*W)
    var = jnp.abs(t.T - mean).mean(0)                                 # (C,)
    scale = 1.0 / (var * _SQRT_HALF_PI + EPS)
    out = (x - mean.reshape(1, C, 1, 1)) * scale.reshape(1, C, 1, 1)
    out = out * weight.reshape(1, C, 1, 1) + bias.reshape(1, C, 1, 1)
    rm = running_mean * MOMENTUM + mean * (1 - MOMENTUM)
    rv = running_var * MOMENTUM + scale * (1 - MOMENTUM)
    return out, rm, rv


if __name__ == "__main__":
    key = jax.random.PRNGKey(0)
    kx, kw, kb = jax.random.split(key, 3)

    B, C, H, W = 2, 4, 16, 16
    x = jax.random.normal(kx, (B, C, H, W), dtype=jnp.float32)

    # Deterministic parameter init (module's __init__ leaves them uninitialized).
    weight = jax.random.normal(kw, (C,), dtype=jnp.float32) * 0.1 + 1.0  # self.scale
    bias = jax.random.normal(kb, (C,), dtype=jnp.float32) * 0.1          # self.mean
    running_mean = jnp.zeros((C,), dtype=jnp.float32)
    running_var = jnp.zeros((C,), dtype=jnp.float32)

    ref_out, ref_rm, ref_rv = _reference(x, weight, bias, running_mean, running_var)

    # Single-pass (VMEM-resident) fast path.
    out, rm_new, rv_new = mean_bn_forward(x, weight, bias, running_mean, running_var)
    jax.block_until_ready((out, rm_new, rv_new))
    assert jnp.allclose(out, ref_out, atol=1e-4, rtol=1e-4)
    assert jnp.allclose(rm_new, ref_rm, atol=1e-5, rtol=1e-5)
    assert jnp.allclose(rv_new, ref_rv, atol=1e-4, rtol=1e-4)

    # Streaming 3-phase fallback (forced) -- exercises the large-slab path and
    # the phase-gated output writeback on a B>1 grid.
    out2, rm2, rv2 = mean_bn_forward(x, weight, bias, running_mean, running_var,
                                     force_multipass=True)
    jax.block_until_ready((out2, rm2, rv2))
    assert jnp.allclose(out2, ref_out, atol=1e-4, rtol=1e-4)
    assert jnp.allclose(rm2, ref_rm, atol=1e-5, rtol=1e-5)
    assert jnp.allclose(rv2, ref_rv, atol=1e-4, rtol=1e-4)

    # TODO(synk): the `noise=True` branch (torch.normal multiplicative noise)
    # is not implemented; default construction uses noise=False.
    # TODO(synk): eval-mode branch (normalize with running stats) not
    # implemented; this kernel covers the training-mode forward only.
    print("KERNEL_OK")
</pallas_src>

<mosaic_0001>
module attributes {stable_mosaic.version = 11 : i64} {
  func.func @_meanbn_onepass_kernel(%arg0: i32, %arg1: memref<2x4x256xf32, #tpu.memory_space<vmem>>, %arg2: memref<4x1xf32, #tpu.memory_space<vmem>>, %arg3: memref<4x1xf32, #tpu.memory_space<vmem>>, %arg4: memref<4x1xf32, #tpu.memory_space<vmem>>, %arg5: memref<4x1xf32, #tpu.memory_space<vmem>>, %arg6: memref<2x4x256xf32, #tpu.memory_space<vmem>>, %arg7: memref<4x1xf32, #tpu.memory_space<vmem>>, %arg8: memref<4x1xf32, #tpu.memory_space<vmem>>) attributes {dimension_semantics = [#tpu.dimension_semantics<parallel>], iteration_bounds = array<i64: 1>, scalar_prefetch = 0 : i64, scratch_operands = 0 : i64, tpu.core_type = #tpu.core_type<tc>, window_params = [{transform_indices = @transform_0, window_bounds = array<i64: 2, 4, 256>}, {transform_indices = @transform_1, window_bounds = array<i64: 4, 1>}, {transform_indices = @transform_2, window_bounds = array<i64: 4, 1>}, {transform_indices = @transform_3, window_bounds = array<i64: 4, 1>}, {transform_indices = @transform_4, window_bounds = array<i64: 4, 1>}, {transform_indices = @transform_5, window_bounds = array<i64: 2, 4, 256>}, {transform_indices = @transform_6, window_bounds = array<i64: 4, 1>}, {transform_indices = @transform_7, window_bounds = array<i64: 4, 1>}]} {
    %c0 = arith.constant 0 : index
    %c0_0 = arith.constant 0 : index
    %c0_1 = arith.constant 0 : index
    %0 = vector.load %arg1[%c0, %c0_0, %c0_1] : memref<2x4x256xf32, #tpu.memory_space<vmem>>, vector<2x4x256xf32>
    %cst = arith.constant 1.000000e+00 : f32
    %1 = vector.broadcast %cst : f32 to vector<256x1xf32>
    %cst_2 = arith.constant dense<0.000000e+00> : vector<4x256xf32>
    %2 = vector.multi_reduction <add>, %0, %cst_2 [0] : vector<2x4x256xf32> to vector<4x256xf32>
    %cst_3 = arith.constant dense<0.000000e+00> : vector<4x1xf32>
    %3 = tpu.matmul %2, %1, %cst_3 {dimension_numbers = #tpu.dot_dimension_numbers<[1], [0], [0], [1], [0, 0, 1, 1], [], []>} : vector<4x256xf32>, vector<256x1xf32>, vector<4x1xf32> -> vector<4x1xf32>
    %cst_4 = arith.constant 0.001953125 : f32
    %4 = vector.broadcast %cst_4 : f32 to vector<4x1xf32>
    %5 = arith.mulf %3, %4 : vector<4x1xf32>
    %6 = vector.shape_cast %5 : vector<4x1xf32> to vector<1x4x1xf32>
    %7 = vector.broadcast %6 : vector<1x4x1xf32> to vector<2x4x256xf32>
    %8 = arith.subf %0, %7 : vector<2x4x256xf32>
    %9 = math.absf %8 : vector<2x4x256xf32>
    %cst_5 = arith.constant dense<0.000000e+00> : vector<4x256xf32>
    %10 = vector.multi_reduction <add>, %9, %cst_5 [0] : vector<2x4x256xf32> to vector<4x256xf32>
    %cst_6 = arith.constant dense<0.000000e+00> : vector<4x1xf32>
    %11 = tpu.matmul %10, %1, %cst_6 {dimension_numbers = #tpu.dot_dimension_numbers<[1], [0], [0], [1], [0, 0, 1, 1], [], []>} : vector<4x256xf32>, vector<256x1xf32>, vector<4x1xf32> -> vector<4x1xf32>
    %cst_7 = arith.constant 0.001953125 : f32
    %12 = vector.broadcast %cst_7 : f32 to vector<4x1xf32>
    %13 = arith.mulf %11, %12 : vector<4x1xf32>
    %cst_8 = arith.constant 1.25331414 : f32
    %14 = vector.broadcast %cst_8 : f32 to vector<4x1xf32>
    %15 = arith.mulf %13, %14 : vector<4x1xf32>
    %cst_9 = arith.constant 1.000000e-07 : f32
    %16 = vector.broadcast %cst_9 : f32 to vector<4x1xf32>
    %17 = arith.addf %15, %16 : vector<4x1xf32>
    %18 = tpu.reciprocal %17 : vector<4x1xf32> -> vector<4x1xf32>
    %c0_10 = arith.constant 0 : index
    %c0_11 = arith.constant 0 : index
    %19 = vector.load %arg2[%c0_10, %c0_11] : memref<4x1xf32, #tpu.memory_space<vmem>>, vector<4x1xf32>
    %20 = arith.mulf %18, %19 : vector<4x1xf32>
    %c0_12 = arith.constant 0 : index
    %c0_13 = arith.constant 0 : index
    %21 = vector.load %arg3[%c0_12, %c0_13] : memref<4x1xf32, #tpu.memory_space<vmem>>, vector<4x1xf32>
    %22 = arith.mulf %5, %20 : vector<4x1xf32>
    %23 = arith.subf %21, %22 : vector<4x1xf32>
    %24 = vector.shape_cast %20 : vector<4x1xf32> to vector<1x4x1xf32>
    %25 = vector.broadcast %24 : vector<1x4x1xf32> to vector<2x4x256xf32>
    %26 = arith.mulf %0, %25 : vector<2x4x256xf32>
    %27 = vector.shape_cast %23 : vector<4x1xf32> to vector<1x4x1xf32>
    %28 = vector.broadcast %27 : vector<1x4x1xf32> to vector<2x4x256xf32>
    %29 = arith.addf %26, %28 : vector<2x4x256xf32>
    %c0_14 = arith.constant 0 : index
    %c0_15 = arith.constant 0 : index
    %c0_16 = arith.constant 0 : index
    %30 = vector.load %arg6[%c0_14, %c0_15, %c0_16] : memref<2x4x256xf32, #tpu.memory_space<vmem>>, vector<2x4x256xf32>
    tpu.vector_store %arg6[%c0_14, %c0_15, %c0_16], %29 {strides = array<i32>} : memref<2x4x256xf32, #tpu.memory_space<vmem>>, vector<2x4x256xf32>,
    %c0_17 = arith.constant 0 : index
    %c0_18 = arith.constant 0 : index
    %31 = vector.load %arg4[%c0_17, %c0_18] : memref<4x1xf32, #tpu.memory_space<vmem>>, vector<4x1xf32>
    %cst_19 = arith.constant 1.000000e-01 : f32
    %32 = vector.broadcast %cst_19 : f32 to vector<4x1xf32>
    %33 = arith.mulf %31, %32 : vector<4x1xf32>
    %cst_20 = arith.constant 0.899999976 : f32
    %34 = vector.broadcast %cst_20 : f32 to vector<4x1xf32>
    %35 = arith.mulf %5, %34 : vector<4x1xf32>
    %36 = arith.addf %33, %35 : vector<4x1xf32>
    %c0_21 = arith.constant 0 : index
    %c0_22 = arith.constant 0 : index
    %37 = vector.load %arg7[%c0_21, %c0_22] : memref<4x1xf32, #tpu.memory_space<vmem>>, vector<4x1xf32>
    tpu.vector_store %arg7[%c0_21, %c0_22], %36 {strides = array<i32>} : memref<4x1xf32, #tpu.memory_space<vmem>>, vector<4x1xf32>,
    %c0_23 = arith.constant 0 : index
    %c0_24 = arith.constant 0 : index
    %38 = vector.load %arg5[%c0_23, %c0_24] : memref<4x1xf32, #tpu.memory_space<vmem>>, vector<4x1xf32>
    %cst_25 = arith.constant 1.000000e-01 : f32
    %39 = vector.broadcast %cst_25 : f32 to vector<4x1xf32>
    %40 = arith.mulf %38, %39 : vector<4x1xf32>
    %cst_26 = arith.constant 0.899999976 : f32
    %41 = vector.broadcast %cst_26 : f32 to vector<4x1xf32>
    %42 = arith.mulf %18, %41 : vector<4x1xf32>
    %43 = arith.addf %40, %42 : vector<4x1xf32>
    %c0_27 = arith.constant 0 : index
    %c0_28 = arith.constant 0 : index
    %44 = vector.load %arg8[%c0_27, %c0_28] : memref<4x1xf32, #tpu.memory_space<vmem>>, vector<4x1xf32>
    tpu.vector_store %arg8[%c0_27, %c0_28], %43 {strides = array<i32>} : memref<4x1xf32, #tpu.memory_space<vmem>>, vector<4x1xf32>,
    return
  }
  func.func @transform_0(%arg0: i32) -> (i32, i32, i32) {
    %c0_i32 = arith.constant 0 : i32
    %c0_i32_0 = arith.constant 0 : i32
    %c0_i32_1 = arith.constant 0 : i32
    return %c0_i32, %arg0, %c0_i32_0 : i32, i32, i32
  }
  func.func @transform_1(%arg0: i32) -> (i32, i32) {
    %c0_i32 = arith.constant 0 : i32
    %c0_i32_0 = arith.constant 0 : i32
    return %arg0, %c0_i32 : i32, i32
  }
  func.func @transform_2(%arg0: i32) -> (i32, i32) {
    %c0_i32 = arith.constant 0 : i32
    %c0_i32_0 = arith.constant 0 : i32
    return %arg0, %c0_i32 : i32, i32
  }
  func.func @transform_3(%arg0: i32) -> (i32, i32) {
    %c0_i32 = arith.constant 0 : i32
    %c0_i32_0 = arith.constant 0 : i32
    return %arg0, %c0_i32 : i32, i32
  }
  func.func @transform_4(%arg0: i32) -> (i32, i32) {
    %c0_i32 = arith.constant 0 : i32
    %c0_i32_0 = arith.constant 0 : i32
    return %arg0, %c0_i32 : i32, i32
  }
  func.func @transform_5(%arg0: i32) -> (i32, i32, i32) {
    %c0_i32 = arith.constant 0 : i32
    %c0_i32_0 = arith.constant 0 : i32
    %c0_i32_1 = arith.constant 0 : i32
    return %c0_i32, %arg0, %c0_i32_0 : i32, i32, i32
  }
  func.func @transform_6(%arg0: i32) -> (i32, i32) {
    %c0_i32 = arith.constant 0 : i32
    %c0_i32_0 = arith.constant 0 : i32
    return %arg0, %c0_i32 : i32, i32
  }
  func.func @transform_7(%arg0: i32) -> (i32, i32) {
    %c0_i32 = arith.constant 0 : i32
    %c0_i32_0 = arith.constant 0 : i32
    return %arg0, %c0_i32 : i32, i32
  }
}

</mosaic_0001>

<bundles_post_ra>
// kernel: tpu_custom_call.1
= control target key start
LH: loop header
LB: loop body
LE: loop exit
PB: predicated region body
PF: predicated region fallthrough
CT: control target
= control target key end

     0   :  { %vm32_vm0 = vcmask 1043456   ;;  %v420_v2 = vmov 1.0|1.0   ;;  %s526_s0 = inlined_call_operand.vmem [shape: f32[2,4,256], index: 0, kind: input, shape index: {}]   ;;  %s527_s1 = inlined_call_operand.vmem [shape: f32[4,1], index: 1, kind: input, shape index: {}]   ;;  %s528_s2 = inlined_call_operand.vmem [shape: f32[4,1], index: 2, kind: input, shape index: {}]   ;;  %s529_s3 = inlined_call_operand.vmem [shape: f32[4,1], index: 3, kind: input, shape index: {}]   ;;  %s530_s4 = inlined_call_operand.vmem [shape: f32[4,1], index: 4, kind: input, shape index: {}]   ;;  %s531_s5 = inlined_call_operand.hbm [shape: f32[2,4,256], index: 5, kind: output, shape index: {0}]   ;;  %s532_s6 = inlined_call_operand.vmem [shape: f32[4,1], index: 6, kind: output, shape index: {1}]   ;;  %s533_s7 = inlined_call_operand.vmem [shape: f32[4,1], index: 7, kind: output, shape index: {2}]  }
   0x1   :  { %v469_v0 = vld [vmem:[%s526_s0] sm:$0xff]  ;;  %v474_v1 = vld [vmem:[%s526_s0 + $0x8] sm:$0xff]  ;;  %352 = vmatprep.subr.bf16.mxu0 %v420_v2  ;;  %368 = vmatprep.subr.bf16.mxu1 %v420_v2 }
   0x2   :  { %v28_v3 = vcombine.high %v469_v0, %v469_v0  ;;  %v29_v4 = vcombine.high %v474_v1, %v474_v1 }
   0x3   :  { %13 = vsyncpa [#allocation3], 0  ;;  %353 = vmatpush3.bf16.msra.mxu0 %v420_v2  ;;  %369 = vmatpush3.bf16.msra.mxu1 %v420_v2  ;;  %v33_v8 = vsel %vm32_vm0, %v469_v0, 0.0  ;;  %v34_v9 = vsel %vm32_vm0, %v474_v1, 0.0  ;;  %v421_v11 = vmov 0   ;;  %vm251_vm1 = vcmask 3072  }
   0x4   :  { %354 = vmatprep.subr.bf16.mxu0 %v420_v2  ;;  %v36_v5 = vsel %vm32_vm0, %v28_v3, 0.0  ;;  %v37_v6 = vsel %vm32_vm0, %v29_v4, 0.0  ;;  %370 = vmatprep.subr.bf16.mxu1 %v420_v2  ;;  %v35_v10 = vadd.f32 %v34_v9, %v33_v8  ;;  %v247_v14 = vld [vmem:[%s529_s3] sm:$0xf]  ;;  %v422_v20 = vmov 839922192  }
   0x5   :  { %v38_v7 = vadd.f32 %v37_v6, %v36_v5  ;;  %390 = vset.pattern.permute.xlu0 %v421_v11  ;;  %391 = vset.pattern.permute.xlu1 %v421_v11  ;;  %v248_v17 = vmul.f32 0.1, %v247_v14  ;;  %v115_v21 = vunpack.c.l.s4 %v422_v20  ;;  %v117_v22 = vlaneseq  ;;  %v253_v46 = vld [vmem:[%s530_s4] sm:$0xf] }
   0x6   :  { %v212_v47 = vld [vmem:[%s527_s1] sm:$0xf]  ;;  %v254_v48 = vmul.f32 0.1, %v253_v46  ;;  %s423_s1 = smov [#allocation2]  }
   0x7   :  { %355 = vmatpush3.bf16.msra.mxu0 %v420_v2  ;;  %103 = vmatprep.mubr.f32.mxu0 %v38_v7  ;;  %v116_v23 = vunpack.c.0.s8 %v115_v21  ;;  %v118_v24 = vshrl.u32 %v117_v22, 7  ;;  %v214_v52 = vld [vmem:[%s528_s2] sm:$0xf]  ;;  %s263_s4 = sshll.u32 %s423_s1, 4  ;;  %s264_s4 = int_to_ptr.vmem [resolvable:$true] %s263_s4 }
   0x8   :  { %356 = vmatprep.subr.bf16.mxu0 %v420_v2  ;;  %371 = vmatpush3.bf16.msra.mxu1 %v420_v2  ;;  %s396_s2 = scalar_lea.vmem %s264_s4, 256  ;;  %p401_p1 = scmp.lt.s32.totalorder %s264_s4, %s264_s4 }
   0x9   :  { %372 = vmatprep.subr.bf16.mxu1 %v420_v2  ;;  %v119_v25 = vsub.s32 %v116_v23, %v118_v24  ;;  %p397_p0 = scmp.ne.s32.totalorder %s264_s4, %s396_s2  ;;  %p402_p2 = scmp.lt.s32.totalorder %s396_s2, %s396_s2 }
   0xb   :  { %357 = vmatpush3.bf16.msra.mxu0 %v420_v2  ;;  %p403_p3 = por %p402_p2, %p401_p1 }
   0xc   :  { %358 = vmatprep.subr.bf16.mxu0 %v420_v2  ;;  %373 = vmatpush3.bf16.msra.mxu1 %v420_v2 }
   0xd   :  { %374 = vmatprep.subr.bf16.mxu1 %v420_v2  ;;  %p404_p4 = pnand %p403_p3, %p397_p0 }
   0xf   :  { %359 = vmatpush3.bf16.msra.mxu0 %v420_v2 }
  0x10   :  { %360 = vmatprep.subr.bf16.mxu0 %v420_v2  ;;  %375 = vmatpush3.bf16.msra.mxu1 %v420_v2 }
  0x11   :  { %376 = vmatprep.subr.bf16.mxu1 %v420_v2 }
  0x13   :  { %361 = vmatpush3.bf16.msra.mxu0 %v420_v2 }
  0x14   :  { %362 = vmatprep.subr.bf16.mxu0 %v420_v2  ;;  %377 = vmatpush3.bf16.msra.mxu1 %v420_v2 }
  0x15   :  { %378 = vmatprep.subr.bf16.mxu1 %v420_v2 }
  0x17   :  { %363 = vmatpush3.bf16.msra.mxu0 %v420_v2 }
  0x18   :  { %364 = vmatprep.subr.bf16.mxu0 %v420_v2  ;;  %379 = vmatpush3.bf16.msra.mxu1 %v420_v2 }
  0x19   :  { %380 = vmatprep.subr.bf16.mxu1 %v420_v2 }
  0x1b   :  { %365 = vmatpush3.bf16.msra.mxu0 %v420_v2 }
  0x1c   :  { %366 = vmatprep.subr.bf16.mxu0 %v420_v2  ;;  %381 = vmatpush3.bf16.msra.mxu1 %v420_v2 }
  0x1d   :  { %382 = vmatprep.subr.bf16.mxu1 %v420_v2 }
  0x1f   :  { %367 = vmatpush3.bf16.msra.mxu0 %v420_v2 }
  0x20   :  { %383 = vmatpush3.bf16.msra.mxu1 %v420_v2 }
  0x22   :  { %104 = vmatmul.mubr.f32.vlgmr.msra.gmra.mrb[0].mxu0 %v35_v10 }
  0xf5   :  { %v314_v12 = vpop.f32.mrb[0].mxu0 }
  0xf6   :  { %v315_v13 = vpop.f32.mrb[1].mxu0 }
  0xf7   :  { %v316_v15 = vadd.f32 %v315_v13, %v314_v12 }
  0xf9   :  { %v109_v16 = vmul.f32 0.001953125, %v316_v15 }
  0xfb   :  { %v249_v18 = vmul.f32 0.9, %v109_v16  ;;  %112 = vperm.xlu0 %390, %v109_v16  }
  0xfd   :  { %v250_v19 = vadd.f32 %v249_v18, %v248_v17 }
  0xff   :  { %252 = vst.msk [vmem:[%s532_s6] sm:$0xf] %vm251_vm1, %v250_v19 }
 0x17a   :  { %v113_v26 = vpop.permute.xlu0 %112 }
 0x17b   :  { %v120_v27 = vrot.slane %v113_v26, %v119_v25 }
 0x17d   :  { %v122_v28 = vsub.f32 %v469_v0, %v120_v27  ;;  %v123_v29 = vsub.f32 %v474_v1, %v120_v27 }
 0x17f   :  { %v124_v30 = vand.u32 2147483647, %v122_v28  ;;  %v125_v31 = vand.u32 2147483647, %v123_v29 }
 0x181   :  { %v128_v32 = vcombine.high %v124_v30, %v124_v30  ;;  %v129_v33 = vcombine.high %v125_v31, %v125_v31  ;;  %v132_v34 = vsel %vm32_vm0, %v124_v30, 0.0  ;;  %v133_v35 = vsel %vm32_vm0, %v125_v31, 0.0 }
 0x182   :  { %v134_v39 = vadd.f32 %v133_v35, %v132_v34 }
 0x183   :  { %v135_v36 = vsel %vm32_vm0, %v128_v32, 0.0  ;;  %v136_v37 = vsel %vm32_vm0, %v129_v33, 0.0 }
 0x184   :  { %v137_v38 = vadd.f32 %v136_v37, %v135_v36 }
 0x186   :  { %202 = vmatprep.mubr.f32.mxu1 %v137_v38 }
 0x187   :  { %203 = vmatmul.mubr.f32.vlgmr.msra.gmra.mrb[0].mxu1 %v134_v39 }
 0x25a   :  { %v349_v40 = vpop.f32.mrb[0].mxu1 }
 0x25b   :  { %v350_v41 = vpop.f32.mrb[1].mxu1 }
 0x25c   :  { %v351_v42 = vadd.f32 %v350_v41, %v349_v40 }
 0x25e   :  { %v208_v43 = vmul.f32 0.001953125, %v351_v42 }
 0x260   :  { %v209_v44 = vmul.f32 1.2533141, %v208_v43 }
 0x262   :  { %v210_v45 = vadd.f32 1e-07, %v209_v44 }
 0x264   :  { %394 = vrcp.f32 %v210_v45 }
 0x26e   :  { %v395_v49 = vpop.eup %394 }
 0x26f   :  { %v255_v50 = vmul.f32 0.9, %v395_v49  ;;  %v213_v51 = vmul.f32 %v395_v49, %v212_v47 }
 0x271   :  { %v256_v53 = vadd.f32 %v255_v50, %v254_v48  ;;  %219 = vperm.xlu0 %390, %v213_v51   ;;  %v215_v54 = vmul.f32 %v213_v51, %v109_v16 }
 0x273   :  { %257 = vst.msk [vmem:[%s533_s7] sm:$0xf] %vm251_vm1, %v256_v53  ;;  %v216_v55 = vsub.f32 %v214_v52, %v215_v54 }
 0x275   :  { %233 = vperm.xlu1 %391, %v216_v55  }
 0x2f0   :  { %v220_v56 = vpop.permute.xlu0 %219 }
 0x2f1   :  { %v227_v57 = vrot.slane %v220_v56, %v119_v25 }
 0x2f3   :  { %v229_v59 = vmul.f32 %v227_v57, %v469_v0  ;;  %v230_v60 = vmul.f32 %v227_v57, %v474_v1 }
 0x2f4   :  { %v234_v58 = vpop.permute.xlu1 %233 }
 0x2f5   :  { %v241_v61 = vrot.slane %v234_v58, %v119_v25 }
 0x2f7   :  { %v243_v62 = vadd.f32 %v241_v61, %v229_v59  ;;  %v244_v63 = vadd.f32 %v241_v61, %v230_v60 }
 0x2f9   :  { %245 = vst [vmem:[#allocation2] sm:$0xff] %v243_v62  ;;  %246 = vst [vmem:[#allocation2 + $0x8] sm:$0xff] %v244_v63 }
 0x2fa   :  { %407 = shalt.err (!%p404_p4)
}
 0x2fb   :  { %s408_s15 = scalar_lea.hbm %s531_s5, 256 }
 0x2fc   :  { %p409_p5 = scmp.ne.s32.totalorder %s531_s5, %s408_s15  ;;  %p412_p6 = scmp.lt.u32.totalorder %s408_s15, %s531_s5 }
 0x2fe   :  { %p414_p7 = pnand %p412_p6, %p409_p5 }
 0x300   :  { %417 = shalt.err (!%p414_p7)
}
 0x301   :  { %s424_s20 = smov 128   ;;  %s425_s21 = smov 8  }
 0x302   :  { %269 = dma.vmem_to_hbm [thread:$0]  %s264_s4, 256, %s531_s5, [#allocation3], %s424_s20, %s424_s20, %s425_s21  }
 0x303   :  { %418 = dma.done.wait [#allocation3], 256  }
 0x304   :  { %419 = vsyncadd [#allocation3], 4294967040 }
 0x305   :  { %281 = vsyncpa [#allocation3], 1 }

</bundles_post_ra>
